<compile_context>
chip_gen: v5e
topology: v5e:2x2
jax: 0.10.0
libtpu: 0.0.40
codegen_flags: <defaults>
</compile_context>

<pallas_src>
import jax
import jax.numpy as jnp
from jax.experimental import pallas as pl
from jax.experimental.pallas import tpu as pltpu

HIDDEN_PAD = 128  # lane-dense hidden width (original H=64 zero-padded)


# ----------------------------------------------------------------------------
# Pallas kernel: full GCN forward hot path out of VMEM.
#   h = relu(A @ (x @ W1) + b1)
#   h = relu(A @ (h @ W2) + b2)
#   logits = (PA @ h) @ Wfold + bfold          # folded conv3 + mean-pool + lin
#   out = log_softmax(logits, axis=1)
# ----------------------------------------------------------------------------
def gcn_forward_kernel(a_ref, x_ref, w1_ref, w2_ref, wf_ref, pa_ref,
                       b12_ref, bfold_ref, out_ref):
    a = a_ref[...]                         # [N, N]   bf16
    x = x_ref[...]                         # [N, Fin] bf16
    b1 = b12_ref[0:1, :]                   # [1, HP]  f32
    b2 = b12_ref[1:2, :]                   # [1, HP]  f32

    # --- conv1 + relu ---
    h = jnp.dot(x, w1_ref[...], preferred_element_type=jnp.float32)              # [N, HP]
    h = jnp.dot(a, h.astype(jnp.bfloat16), preferred_element_type=jnp.float32) + b1
    h = jnp.maximum(h, 0.0)

    # --- conv2 + relu ---
    h = jnp.dot(h.astype(jnp.bfloat16), w2_ref[...], preferred_element_type=jnp.float32)
    h = jnp.dot(a, h.astype(jnp.bfloat16), preferred_element_type=jnp.float32) + b2
    h = jnp.maximum(h, 0.0)

    # --- folded conv3 + global_mean_pool + linear head ---
    g = jnp.dot(pa_ref[...], h.astype(jnp.bfloat16),
                preferred_element_type=jnp.float32)                              # [B, HP]
    logits = jnp.dot(g.astype(jnp.bfloat16), wf_ref[...],
                     preferred_element_type=jnp.float32) + bfold_ref[...]        # [B, OUT]

    # TODO(synk): dropout(p=0.5) implemented in eval mode (identity); torch
    # train-mode RNG cannot be reproduced bit-exactly.

    # --- log_softmax(dim=1), numerically stable, f32 ---
    m = jnp.max(logits, axis=1, keepdims=True)
    z = logits - m
    lse = jnp.log(jnp.sum(jnp.exp(z), axis=1, keepdims=True))
    out_ref[...] = z - lse


# ----------------------------------------------------------------------------
# Glue: pad / fold / cast operands exactly as the kernel consumes them.
# ----------------------------------------------------------------------------
def pack_operands(a_hat, x, params, pool, hidden_pad=HIDDEN_PAD):
    w1, b1, w2, b2, w3, b3, wl, bl = params
    pc = lambda m: jnp.pad(m, ((0, 0), (0, hidden_pad - m.shape[1])))  # pad cols
    pr = lambda m: jnp.pad(m, ((0, hidden_pad - m.shape[0]), (0, 0)))  # pad rows
    bf = lambda m: m.astype(jnp.bfloat16)

    return dict(
        a=bf(a_hat),                                             # [N, N]    bf16
        x=bf(x),                                                 # [N, Fin]  bf16
        w1=bf(pc(w1)),                                           # [Fin, HP] bf16
        w2=bf(pr(pc(w2))),                                       # [HP, HP]  bf16
        wf=bf(pr(w3 @ wl)),                                      # [HP, OUT] bf16 (w3@wl folded)
        pa=bf(pool @ a_hat),                                     # [B, N]    bf16 (pool@A folded)
        b12=jnp.concatenate([pc(b1), pc(b2)], 0).astype(jnp.float32),  # [2, HP] f32
        bfold=(b3 @ wl + bl).astype(jnp.float32),                # [1, OUT]  f32
    )


def gcn_forward(a_hat, x, params, pool):
    ops = pack_operands(a_hat, x, params, pool)
    B = pool.shape[0]
    n_out = params[6].shape[1]
    vmem = pl.BlockSpec(memory_space=pltpu.MemorySpace.VMEM)
    return pl.pallas_call(
        gcn_forward_kernel,
        out_shape=jax.ShapeDtypeStruct((B, n_out), jnp.float32),
        in_specs=[vmem] * 8,
        out_specs=vmem,
    )(ops["a"], ops["x"], ops["w1"], ops["w2"], ops["wf"], ops["pa"],
      ops["b12"], ops["bfold"])


# ----------------------------------------------------------------------------
# Graph / parameter construction + references.
# ----------------------------------------------------------------------------
def build_a_hat(edge_index, num_nodes):
    src, dst = edge_index[0], edge_index[1]
    A = jnp.zeros((num_nodes, num_nodes), jnp.float32)
    A = A.at[dst, src].add(1.0)                      # A[target, source]
    A = A + jnp.eye(num_nodes, dtype=jnp.float32)    # self loops
    deg = jnp.sum(A, axis=1)
    d_inv_sqrt = jnp.where(deg > 0, 1.0 / jnp.sqrt(deg), 0.0)
    return d_inv_sqrt[:, None] * A * d_inv_sqrt[None, :]


def build_pool_matrix(batch, num_graphs):
    onehot = (batch[None, :] == jnp.arange(num_graphs)[:, None]).astype(jnp.float32)
    counts = jnp.maximum(jnp.sum(onehot, axis=1, keepdims=True), 1.0)
    return onehot / counts                           # [B, N]


def init_params(key, in_ch=4, hidden=64, out_ch=2):
    ks = jax.random.split(key, 8)
    w = lambda k, shape, fan_in: jax.random.normal(k, shape, jnp.float32) / jnp.sqrt(fan_in)
    return (w(ks[0], (in_ch, hidden), in_ch),
            jax.random.normal(ks[1], (1, hidden), jnp.float32) * 0.01,
            w(ks[2], (hidden, hidden), hidden),
            jax.random.normal(ks[3], (1, hidden), jnp.float32) * 0.01,
            w(ks[4], (hidden, hidden), hidden),
            jax.random.normal(ks[5], (1, hidden), jnp.float32) * 0.01,
            w(ks[6], (hidden, out_ch), hidden),
            jax.random.normal(ks[7], (1, out_ch), jnp.float32) * 0.01)


def reference_forward_f32(a_hat, x, params, pool):
    """Exact module semantics in f32 (unfolded, unpadded)."""
    w1, b1, w2, b2, w3, b3, wl, bl = params
    h = jnp.maximum(a_hat @ (x @ w1) + b1, 0.0)
    h = jnp.maximum(a_hat @ (h @ w2) + b2, 0.0)
    h = a_hat @ (h @ w3) + b3
    g = pool @ h
    logits = g @ wl + bl
    return jax.nn.log_softmax(logits, axis=1)


def emulate_kernel(ops):
    """Plain-JAX mirror of the kernel math (bf16 operands, f32 accum, folded tail)."""
    f32, bf16 = jnp.float32, jnp.bfloat16
    a, x = ops["a"], ops["x"]
    b1, b2 = ops["b12"][0:1, :], ops["b12"][1:2, :]
    h = jnp.dot(x, ops["w1"], preferred_element_type=f32)
    h = jnp.dot(a, h.astype(bf16), preferred_element_type=f32) + b1
    h = jnp.maximum(h, 0.0)
    h = jnp.dot(h.astype(bf16), ops["w2"], preferred_element_type=f32)
    h = jnp.dot(a, h.astype(bf16), preferred_element_type=f32) + b2
    h = jnp.maximum(h, 0.0)
    g = jnp.dot(ops["pa"], h.astype(bf16), preferred_element_type=f32)
    logits = jnp.dot(g.astype(bf16), ops["wf"], preferred_element_type=f32) + ops["bfold"]
    return jax.nn.log_softmax(logits, axis=1)


if __name__ == "__main__":
    key = jax.random.PRNGKey(0)
    k_x, k_e, k_p = jax.random.split(key, 3)

    N = 16          # total nodes (graph 0: nodes 0..7, graph 1: nodes 8..15)
    E = 40          # directed edges
    IN_CH, HIDDEN, OUT_CH = 4, 64, 2
    NUM_GRAPHS = 2

    # node features [N, 4]
    x = jax.random.normal(k_x, (N, IN_CH), jnp.float32)

    # random edges, kept within each graph's node range
    ke1, ke2 = jax.random.split(k_e)
    src0 = jax.random.randint(ke1, (E // 2,), 0, N // 2)
    dst0 = jax.random.randint(ke2, (E // 2,), 0, N // 2)
    src1 = jax.random.randint(ke2, (E // 2,), N // 2, N)
    dst1 = jax.random.randint(ke1, (E // 2,), N // 2, N)
    edge_index = jnp.stack([jnp.concatenate([src0, src1]),
                            jnp.concatenate([dst0, dst1])], axis=0)   # [2, E]

    # batch vector: first half -> graph 0, second half -> graph 1
    batch = jnp.concatenate([jnp.zeros(N // 2, jnp.int32),
                             jnp.ones(N // 2, jnp.int32)])

    a_hat = build_a_hat(edge_index, N)
    pool = build_pool_matrix(batch, NUM_GRAPHS)
    params = init_params(k_p, IN_CH, HIDDEN, OUT_CH)

    out = gcn_forward(a_hat, x, params, pool)
    out = jax.block_until_ready(out)

    # tight check vs. an exact emulation of the kernel math (bf16/folded/padded)
    ref_tight = emulate_kernel(pack_operands(a_hat, x, params, pool))
    # semantic check vs. the pure-f32 PyTorch-module reference (bf16 tolerance)
    ref_f32 = reference_forward_f32(a_hat, x, params, pool)

    assert out.shape == (NUM_GRAPHS, OUT_CH)
    assert jnp.allclose(out, ref_tight, atol=2e-3, rtol=2e-3)
    assert jnp.allclose(out, ref_f32, atol=5e-2, rtol=5e-2)

    print("KERNEL_OK")
</pallas_src>

<mosaic_0001>
module attributes {stable_mosaic.version = 11 : i64} {
  func.func @gcn_forward_kernel(%arg0: memref<16x16xbf16, #tpu.memory_space<vmem>>, %arg1: memref<16x4xbf16, #tpu.memory_space<vmem>>, %arg2: memref<4x128xbf16, #tpu.memory_space<vmem>>, %arg3: memref<128x128xbf16, #tpu.memory_space<vmem>>, %arg4: memref<128x2xbf16, #tpu.memory_space<vmem>>, %arg5: memref<2x16xbf16, #tpu.memory_space<vmem>>, %arg6: memref<2x128xf32, #tpu.memory_space<vmem>>, %arg7: memref<1x2xf32, #tpu.memory_space<vmem>>, %arg8: memref<2x2xf32, #tpu.memory_space<vmem>>) attributes {dimension_semantics = [], scalar_prefetch = 0 : i64, scratch_operands = 0 : i64, tpu.core_type = #tpu.core_type<tc>} {
    %c0 = arith.constant 0 : index
    %c0_0 = arith.constant 0 : index
    %0 = vector.load %arg0[%c0, %c0_0] : memref<16x16xbf16, #tpu.memory_space<vmem>>, vector<16x16xbf16>
    %c0_1 = arith.constant 0 : index
    %c0_2 = arith.constant 0 : index
    %1 = vector.load %arg1[%c0_1, %c0_2] : memref<16x4xbf16, #tpu.memory_space<vmem>>, vector<16x4xbf16>
    %c0_3 = arith.constant 0 : index
    %c0_4 = arith.constant 0 : index
    %2 = vector.load %arg6[%c0_3, %c0_4] : memref<2x128xf32, #tpu.memory_space<vmem>>, vector<1x128xf32>
    %c1 = arith.constant 1 : index
    %c0_5 = arith.constant 0 : index
    %3 = vector.load %arg6[%c1, %c0_5] : memref<2x128xf32, #tpu.memory_space<vmem>>, vector<1x128xf32>
    %c0_6 = arith.constant 0 : index
    %c0_7 = arith.constant 0 : index
    %4 = vector.load %arg2[%c0_6, %c0_7] : memref<4x128xbf16, #tpu.memory_space<vmem>>, vector<4x128xbf16>
    %cst = arith.constant dense<0.000000e+00> : vector<16x128xf32>
    %5 = tpu.matmul %1, %4, %cst {dimension_numbers = #tpu.dot_dimension_numbers<[1], [0], [0], [1], [0, 0, 1, 1], [], []>} : vector<16x4xbf16>, vector<4x128xbf16>, vector<16x128xf32> -> vector<16x128xf32>
    %6 = arith.truncf %5 : vector<16x128xf32> to vector<16x128xbf16>
    %cst_8 = arith.constant dense<0.000000e+00> : vector<16x128xf32>
    %7 = tpu.matmul %0, %6, %cst_8 {dimension_numbers = #tpu.dot_dimension_numbers<[1], [0], [0], [1], [0, 0, 1, 1], [], []>} : vector<16x16xbf16>, vector<16x128xbf16>, vector<16x128xf32> -> vector<16x128xf32>
    %8 = vector.broadcast %2 : vector<1x128xf32> to vector<16x128xf32>
    %9 = arith.addf %7, %8 : vector<16x128xf32>
    %cst_9 = arith.constant 0.000000e+00 : f32
    %10 = vector.broadcast %cst_9 : f32 to vector<16x128xf32>
    %11 = arith.maximumf %9, %10 : vector<16x128xf32>
    %12 = arith.truncf %11 : vector<16x128xf32> to vector<16x128xbf16>
    %c0_10 = arith.constant 0 : index
    %c0_11 = arith.constant 0 : index
    %13 = vector.load %arg3[%c0_10, %c0_11] : memref<128x128xbf16, #tpu.memory_space<vmem>>, vector<128x128xbf16>
    %cst_12 = arith.constant dense<0.000000e+00> : vector<16x128xf32>
    %14 = tpu.matmul %12, %13, %cst_12 {dimension_numbers = #tpu.dot_dimension_numbers<[1], [0], [0], [1], [0, 0, 1, 1], [], []>} : vector<16x128xbf16>, vector<128x128xbf16>, vector<16x128xf32> -> vector<16x128xf32>
    %15 = arith.truncf %14 : vector<16x128xf32> to vector<16x128xbf16>
    %cst_13 = arith.constant dense<0.000000e+00> : vector<16x128xf32>
    %16 = tpu.matmul %0, %15, %cst_13 {dimension_numbers = #tpu.dot_dimension_numbers<[1], [0], [0], [1], [0, 0, 1, 1], [], []>} : vector<16x16xbf16>, vector<16x128xbf16>, vector<16x128xf32> -> vector<16x128xf32>
    %17 = vector.broadcast %3 : vector<1x128xf32> to vector<16x128xf32>
    %18 = arith.addf %16, %17 : vector<16x128xf32>
    %cst_14 = arith.constant 0.000000e+00 : f32
    %19 = vector.broadcast %cst_14 : f32 to vector<16x128xf32>
    %20 = arith.maximumf %18, %19 : vector<16x128xf32>
    %c0_15 = arith.constant 0 : index
    %c0_16 = arith.constant 0 : index
    %21 = vector.load %arg5[%c0_15, %c0_16] : memref<2x16xbf16, #tpu.memory_space<vmem>>, vector<2x16xbf16>
    %22 = arith.truncf %20 : vector<16x128xf32> to vector<16x128xbf16>
    %cst_17 = arith.constant dense<0.000000e+00> : vector<2x128xf32>
    %23 = tpu.matmul %21, %22, %cst_17 {dimension_numbers = #tpu.dot_dimension_numbers<[1], [0], [0], [1], [0, 0, 1, 1], [], []>} : vector<2x16xbf16>, vector<16x128xbf16>, vector<2x128xf32> -> vector<2x128xf32>
    %24 = arith.truncf %23 : vector<2x128xf32> to vector<2x128xbf16>
    %c0_18 = arith.constant 0 : index
    %c0_19 = arith.constant 0 : index
    %25 = vector.load %arg4[%c0_18, %c0_19] : memref<128x2xbf16, #tpu.memory_space<vmem>>, vector<128x2xbf16>
    %cst_20 = arith.constant dense<0.000000e+00> : vector<2x2xf32>
    %26 = tpu.matmul %24, %25, %cst_20 {dimension_numbers = #tpu.dot_dimension_numbers<[1], [0], [0], [1], [0, 0, 1, 1], [], []>} : vector<2x128xbf16>, vector<128x2xbf16>, vector<2x2xf32> -> vector<2x2xf32>
    %c0_21 = arith.constant 0 : index
    %c0_22 = arith.constant 0 : index
    %27 = vector.load %arg7[%c0_21, %c0_22] : memref<1x2xf32, #tpu.memory_space<vmem>>, vector<1x2xf32>
    %28 = vector.broadcast %27 : vector<1x2xf32> to vector<2x2xf32>
    %29 = arith.addf %26, %28 : vector<2x2xf32>
    %cst_23 = arith.constant dense<0xFF800000> : vector<2xf32>
    %30 = vector.multi_reduction <maximumf>, %29, %cst_23 [1] : vector<2x2xf32> to vector<2xf32>
    %31 = vector.shape_cast %30 : vector<2xf32> to vector<2x1xf32>
    %32 = vector.broadcast %31 : vector<2x1xf32> to vector<2x2xf32>
    %33 = arith.subf %29, %32 : vector<2x2xf32>
    %34 = math.exp %33 : vector<2x2xf32>
    %cst_24 = arith.constant dense<0.000000e+00> : vector<2xf32>
    %35 = vector.multi_reduction <add>, %34, %cst_24 [1] : vector<2x2xf32> to vector<2xf32>
    %36 = vector.shape_cast %35 : vector<2xf32> to vector<2x1xf32>
    %37 = math.log %36 : vector<2x1xf32>
    %38 = vector.broadcast %37 : vector<2x1xf32> to vector<2x2xf32>
    %39 = arith.subf %33, %38 : vector<2x2xf32>
    %c0_25 = arith.constant 0 : index
    %c0_26 = arith.constant 0 : index
    %40 = vector.load %arg8[%c0_25, %c0_26] : memref<2x2xf32, #tpu.memory_space<vmem>>, vector<2x2xf32>
    tpu.vector_store %arg8[%c0_25, %c0_26], %39 {strides = array<i32>} : memref<2x2xf32, #tpu.memory_space<vmem>>, vector<2x2xf32>,
    return
  }
}

</mosaic_0001>

<bundles_post_ra>
// kernel: tpu_custom_call.1
= control target key start
LH: loop header
LB: loop body
LE: loop exit
PB: predicated region body
PF: predicated region fallthrough
CT: control target
= control target key end

     0   :  { %vm47_vm0 = vcmask 1041408   ;;  %vm43_vm1 = vcmask 31744   ;;  %s571_s0 = inlined_call_operand.vmem [shape: bf16[16,16], index: 0, kind: input, shape index: {}]   ;;  %s572_s1 = inlined_call_operand.vmem [shape: bf16[16,4], index: 1, kind: input, shape index: {}]   ;;  %s573_s2 = inlined_call_operand.vmem [shape: bf16[4,128], index: 2, kind: input, shape index: {}]   ;;  %s574_s3 = inlined_call_operand.vmem [shape: bf16[128,128], index: 3, kind: input, shape index: {}]   ;;  %s575_s4 = inlined_call_operand.vmem [shape: bf16[128,2], index: 4, kind: input, shape index: {}]   ;;  %s576_s5 = inlined_call_operand.vmem [shape: bf16[2,16], index: 5, kind: input, shape index: {}]   ;;  %s577_s6 = inlined_call_operand.vmem [shape: f32[2,128], index: 6, kind: input, shape index: {}]   ;;  %s578_s7 = inlined_call_operand.vmem [shape: f32[1,2], index: 7, kind: input, shape index: {}]   ;;  %s579_s8 = inlined_call_operand.hbm [shape: f32[2,2], index: 8, kind: output, shape index: {}]  }
   0x1   :  { %v37_v0 = vld [vmem:[%s573_s2] sm:$0x3] }
   0x2   :  { %v49_v1 = vsel %vm47_vm0, %v37_v0, 0  ;;  %v396_v2 = vld [vmem:[%s572_s1] sm:$0xff] }
   0x3   :  { %58 = vmatpush.bf16.msra.mxu0 %v49_v1 }
   0x4   :  { %13 = vsyncpa [#allocation3], 0  ;;  %v404_v3 = vld [vmem:[%s574_s3 + $0x38] sm:$0xff]  ;;  %v403_v4 = vld [vmem:[%s574_s3 + $0x30] sm:$0xff]  ;;  %vm72_vm2 = vcmask 130048   ;;  %vm289_vm3 = vcmask 9216  }
   0x5   :  { %157 = vmatpush.bf16.msra.mxu2 %v404_v3  ;;  %v402_v5 = vld [vmem:[%s574_s3 + $0x28] sm:$0xff]  ;;  %v401_v6 = vld [vmem:[%s574_s3 + $0x20] sm:$0xff]  ;;  %v400_v11 = vld [vmem:[%s574_s3 + $0x18] sm:$0xff] }
   0x6   :  { %323 = vmatmul.msk.bf16.vlgmr.msra.gmra.mxu0 %vm43_vm1, %v396_v2  ;;  %v395_v10 = vld [vmem:[%s571_s0] sm:$0xff]  ;;  %v399_v12 = vld [vmem:[%s574_s3 + $0x10] sm:$0xff]  ;;  %v398_v13 = vld [vmem:[%s574_s3 + $0x8] sm:$0xff]  ;;  %s310_s0 = sshll.u32 %s579_s8, 4  ;;  %s311_s0 = int_to_ptr.hbm [resolvable:$true] %s310_s0 }
   0x7   :  { %v397_v14 = vld [vmem:[%s574_s3] sm:$0xff]  ;;  %v412_v26 = vld [vmem:[%s575_s4 + $0x38] sm:$0xff]  ;;  %v411_v27 = vld [vmem:[%s575_s4 + $0x30] sm:$0xff] }
   0x8   :  { %v414_v16 = vld [vmem:[%s577_s6] ss:$0 sm:$0xff]  ;;  %276 = vmatpush.bf16.msra.mxu1 %v412_v26  ;;  %v410_v28 = vld [vmem:[%s575_s4 + $0x28] sm:$0xff]  ;;  %v408_v31 = vld [vmem:[%s575_s4 + $0x18] sm:$0xff] }
   0x9   :  { %158 = vmatpush.bf16.msra.mxu2 %v403_v4  ;;  %v409_v29 = vld [vmem:[%s575_s4 + $0x20] sm:$0xff]  ;;  %v407_v33 = vld [vmem:[%s575_s4 + $0x10] sm:$0xff]  ;;  %v406_v36 = vld [vmem:[%s575_s4 + $0x8] sm:$0xff] }
   0xa   :  { %v415_v32 = vld [vmem:[%s577_s6 + $0x1] ss:$0 sm:$0xff]  ;;  %v189_v41 = vld [vmem:[%s576_s5] sm:$0x1] }
   0xb   :  { %v405_v42 = vld [vmem:[%s575_s4] sm:$0xff]  ;;  %s447_s4 = smov [#allocation2]  }
   0xc   :  { %277 = vmatpush.bf16.msra.mxu1 %v411_v27  ;;  %v416_v46 = vld [vmem:[%s578_s7] ss:$0 sm:$0xff]  ;;  %s308_s5 = sshll.u32 %s447_s4, 4  ;;  %s309_s5 = int_to_ptr.vmem [resolvable:$true] %s308_s5 }
   0xd   :  { %159 = vmatpush.bf16.msra.mxu2 %v402_v5 }
  0x10   :  { %278 = vmatpush.bf16.msra.mxu1 %v410_v28 }
  0x11   :  { %160 = vmatpush.bf16.msra.mxu2 %v401_v6 }
  0x14   :  { %279 = vmatpush.bf16.msra.mxu1 %v409_v29 }
  0x15   :  { %161 = vmatpush.bf16.msra.mxu2 %v400_v11 }
  0x18   :  { %280 = vmatpush.bf16.msra.mxu1 %v408_v31 }
  0x19   :  { %162 = vmatpush.bf16.msra.mxu2 %v399_v12 }
  0x1c   :  { %281 = vmatpush.bf16.msra.mxu1 %v407_v33 }
  0x1d   :  { %163 = vmatpush.bf16.msra.mxu2 %v398_v13 }
  0x20   :  { %282 = vmatpush.bf16.msra.mxu1 %v406_v36 }
  0x21   :  { %164 = vmatpush.bf16.msra.mxu2 %v397_v14 }
  0x24   :  { %283 = vmatpush.bf16.msra.mxu1 %v405_v42 }
  0x83   :  { %v60_v7 = vpop.f32.mrf.mxu0 }
  0x8b   :  { %v62_v8 = vpop.f32.mrf.mxu0 }
  0x8c   :  { %v65_v9 = vpack.c.bf16 %v62_v8, %v60_v7 }
  0x8e   :  { %83 = vmatpush.bf16.msra.mxu3 %v65_v9 }
  0x91   :  { %328 = vmatmul.msk.bf16.vlgmr.msra.gmra.mxu3 %vm72_vm2, %v395_v10 }
 0x114   :  { %v85_v15 = vpop.f32.mrf.mxu3 }
 0x115   :  { %v86_v17 = vadd.f32 %v414_v16, %v85_v15 }
 0x117   :  { %v90_v20 = vmax.f32 %v86_v17, 0.0 }
 0x11c   :  { %v87_v18 = vpop.f32.mrf.mxu3 }
 0x11d   :  { %v88_v19 = vadd.f32 %v414_v16, %v87_v18 }
 0x11f   :  { %v91_v21 = vmax.f32 %v88_v19, 0.0 }
 0x121   :  { %v92_v22 = vpack.c.bf16 %v91_v21, %v90_v20 }
 0x123   :  { %165 = vmatmul.bf16.vlgmr.msra.gmra.mxu2 %v92_v22 }
 0x1a6   :  { %v166_v23 = vpop.f32.mrf.mxu2 }
 0x1ae   :  { %v168_v24 = vpop.f32.mrf.mxu2 }
 0x1af   :  { %v171_v25 = vpack.c.bf16 %v168_v24, %v166_v23 }
 0x1b1   :  { %180 = vmatpush.bf16.msrb.mxu3 %v171_v25 }
 0x1b4   :  { %361 = vmatmul.msk.bf16.vlgmr.msrb.gmra.mxu3 %vm72_vm2, %v395_v10 }
 0x237   :  { %v182_v30 = vpop.f32.mrf.mxu3 }
 0x238   :  { %v183_v34 = vadd.f32 %v415_v32, %v182_v30 }
 0x23a   :  { %v187_v38 = vmax.f32 %v183_v34, 0.0 }
 0x23f   :  { %v184_v35 = vpop.f32.mrf.mxu3 }
 0x240   :  { %v185_v37 = vadd.f32 %v415_v32, %v184_v35 }
 0x242   :  { %v188_v39 = vmax.f32 %v185_v37, 0.0 }
 0x244   :  { %v190_v40 = vpack.c.bf16 %v188_v39, %v187_v38 }
 0x246   :  { %201 = vmatpush.bf16.msrb.mxu0 %v190_v40 }
 0x249   :  { %362 = vmatmul.msk.bf16.vlgmr.msrb.gmra.mxu0 %vm72_vm2, %v189_v41 }
 0x2c6   :  { %v203_v43 = vpop.f32.mrf.mxu0 }
 0x2c7   :  { %v207_v44 = vpack.c.bf16 %v203_v43, %v203_v43 }
 0x2c9   :  { %284 = vmatmul.bf16.vlgmr.msra.gmra.mxu1 %v207_v44 }
 0x2ce   :  { %v205_v45 = vpop.f32.mrf.mxu0 }
 0x346   :  { %v285_v47 = vpop.f32.mrf.mxu1 }
 0x347   :  { %v286_v48 = vadd.f32 %v416_v46, %v285_v47 }
 0x349   :  { %v290_v49 = vsel %vm289_vm3, %v286_v48, -inf }
 0x34a   :  { %291 = vmax.xlane.f32.xlu0 %v290_v49 }
 0x34e   :  { %v287_v50 = vpop.f32.mrf.mxu1 }
 0x3bd   :  { %v292_v51 = vpop.xlane.xlu0 %291 }
 0x3be   :  { %v293_v52 = vsub.f32 %v286_v48, %v292_v51 }
 0x3c0   :  { %v294_v53 = vmul.f32 1.442695, %v293_v52 }
 0x3c2   :  { %417 = vpow2.f32 %v294_v53 }
 0x3c8   :  { %v418_v54 = vpop.eup %417 }
 0x3c9   :  { %v296_v55 = vsel %vm289_vm3, %v418_v54, 0.0 }
 0x3ca   :  { %297 = vadd.xlane.f32.xlu0 %v296_v55 }
 0x43d   :  { %v298_v56 = vpop.xlane.xlu0 %297 }
 0x43e   :  { %419 = vlog2.f32 %v298_v56 }
 0x444   :  { %v420_v57 = vpop.eup %419 }
 0x445   :  { %v300_v58 = vmul.f32 0.6931472, %v420_v57 }
 0x447   :  { %v301_v59 = vsub.f32 %v293_v52, %v300_v58 }
 0x449   :  { %302 = vst.msk [vmem:[#allocation2] sm:$0x3] %vm289_vm3, %v301_v59 }
 0x44a   :  { %313 = dma.vmem_to_hbm [thread:$0]  %s309_s5, 32, %s311_s0, [#allocation3]  }
 0x44b   :  { %445 = dma.done.wait [#allocation3], 32  }
 0x44c   :  { %446 = vsyncadd [#allocation3], 4294967264 }
 0x44d   :  { %318 = vsyncpa [#allocation3], 1 }

</bundles_post_ra>
